<compile_context>
chip_gen: v6e
topology: v6e:2x2x1
jax: 0.10.0
libtpu: 0.0.40
codegen_flags: <defaults>
</compile_context>

<pallas_src>
import math
import functools

import jax
import jax.numpy as jnp
from jax import lax
from jax.experimental import pallas as pl
from jax.experimental.pallas import tpu as pltpu


def _round_up(x, m):
    return (x + m - 1) // m * m


def _rnn_chunk_kernel(x_ref, h0_ref, w_ref, b_ref, hseq_ref, z_scr, *,
                      nonlinearity, ip, steps_per_chunk):
    """One grid step = `steps_per_chunk` RNN timesteps.

    h_t = act([x_t | h_{t-1}] @ Wc + b).

    grid=(n_chunks,) is sequential ("arbitrary").  w_ref / b_ref / h0_ref have
    constant index_maps -> DMA'd to VMEM once, resident for all chunks.  The
    recurrent state is carried across timesteps AND chunks inside the staging
    scratch z_scr[:, ip:]  (the carry *is* the matmul operand).
    """
    c = pl.program_id(0)

    @pl.when(c == 0)
    def _():
        # Initialize h_{-1}.  The x half z_scr[:, :ip] is fully overwritten
        # every timestep, so it needs no init.
        z_scr[:, ip:] = h0_ref[...].astype(z_scr.dtype)

    # Hoist the (Bp, Hp) bias broadcast out of the timestep loop.
    bias = jnp.broadcast_to(b_ref[...], hseq_ref.shape[1:])

    def step(s, carry):
        # Lane-aligned, full-width staging write (Ip is a multiple of 128).
        z_scr[:, :ip] = x_ref[s]
        # Single fused MXU matmul: [x_t | h_{t-1}] @ [Wx^T ; Wh^T], f32 acc.
        acc = jnp.dot(z_scr[...], w_ref[...],
                      preferred_element_type=jnp.float32)
        acc = acc + bias
        if nonlinearity == "tanh":            # static (trace-time) branch
            h_new = jnp.tanh(acc)             # f32 elementwise (v5e-safe)
        else:  # 'relu'
            h_new = jnp.maximum(acc, 0.0)
        hseq_ref[s] = h_new.astype(hseq_ref.dtype)
        # Recurrent carry: written straight into the h half of the staging
        # buffer -> no extra per-step VMEM->VMEM copy.
        z_scr[:, ip:] = h_new.astype(z_scr.dtype)
        return carry

    lax.fori_loop(0, steps_per_chunk, step, 0, unroll=True)


def prepare_rnn_params(wx, bx, wh, bh, *, compute_dtype=jnp.float32):
    """One-time parameter prep: [Wx^T ; Wh^T] concat + pad, combined bias.

    Reuse the returned dict across many calls (e.g. single-step decode) so the
    transposes / pads are not on the per-step critical path.
    """
    H, I = wx.shape
    assert wh.shape == (H, H), "wh must be (hidden, hidden)"
    if bx is None:
        bx = jnp.zeros((H,), jnp.float32)
    if bh is None:
        bh = jnp.zeros((H,), jnp.float32)

    # Lane-dense shaping: both halves of [x | h] and the output are padded to
    # multiples of 128 lanes -> unmasked staging stores, clean MXU K/N dims.
    Ip = max(_round_up(I, 128), 128)
    Hp = max(_round_up(H, 128), 128)
    K = Ip + Hp

    # Combined weight.  Padded rows/cols are zero (see invariant at top).
    w_c = jnp.zeros((K, Hp), dtype=compute_dtype)
    w_c = w_c.at[:I, :H].set(wx.T.astype(compute_dtype))
    w_c = w_c.at[Ip:Ip + H, :H].set(wh.T.astype(compute_dtype))

    # Combined bias (bias add + activation stay in f32).
    b_c = jnp.zeros((1, Hp), dtype=jnp.float32)
    b_c = b_c.at[:, :H].set((bx + bh).astype(jnp.float32)[None, :])

    return dict(w_c=w_c, b_c=b_c, input_size=I, hidden_size=H,
                ip=Ip, hp=Hp, compute_dtype=compute_dtype)


def basic_rnn_sequence_prepared(xs, h0, prep, *, nonlinearity="tanh",
                                time_chunk=8, out_dtype=None):
    """Fused multi-timestep BasicRNNCell forward (whole loop in one pallas_call).

    xs : (T, B, input_size);  h0 : (B, hidden_size) or None (-> zeros)
    returns hs : (T, B, hidden_size), hs[t] = act(xs[t]@Wx^T+bx + h_{t-1}@Wh^T+bh)
    """
    if nonlinearity not in ("tanh", "relu"):
        raise ValueError("Invalid nonlinearity selected for RNN.")

    T, B, I = xs.shape
    assert I == prep["input_size"]
    H = prep["hidden_size"]
    Ip, Hp = prep["ip"], prep["hp"]
    cdt = prep["compute_dtype"]
    K = Ip + Hp
    out_dtype = xs.dtype if out_dtype is None else out_dtype

    if h0 is None:
        h0 = jnp.zeros((B, H), dtype=xs.dtype)

    # bf16 packs 16 rows per vreg -> pad batch to 16 sublanes; f32 -> 8.
    b_align = 16 if jnp.dtype(cdt).itemsize < 4 else 8
    Bp = max(_round_up(B, b_align), b_align)

    # Time-chunking: TC timesteps per grid step (padded T with zero x; the
    # padded trailing steps are computed but sliced away).
    TC = max(1, min(time_chunk, T))
    Tp = _round_up(T, TC)
    n_chunks = Tp // TC

    xs_p = jnp.zeros((Tp, Bp, Ip), dtype=cdt)
    xs_p = xs_p.at[:T, :B, :I].set(xs.astype(cdt))
    h0_p = jnp.zeros((Bp, Hp), dtype=jnp.float32)
    h0_p = h0_p.at[:B, :H].set(h0.astype(jnp.float32))

    kernel = functools.partial(_rnn_chunk_kernel, nonlinearity=nonlinearity,
                               ip=Ip, steps_per_chunk=TC)

    hs_p = pl.pallas_call(
        kernel,
        out_shape=jax.ShapeDtypeStruct((Tp, Bp, Hp), out_dtype),
        grid=(n_chunks,),
        in_specs=[
            pl.BlockSpec((TC, Bp, Ip), lambda c: (c, 0, 0)),   # x chunk
            pl.BlockSpec((Bp, Hp), lambda c: (0, 0)),          # h0 (resident)
            pl.BlockSpec((K, Hp), lambda c: (0, 0)),           # weights (resident)
            pl.BlockSpec((1, Hp), lambda c: (0, 0)),           # bias (resident)
        ],
        out_specs=pl.BlockSpec((TC, Bp, Hp), lambda c: (c, 0, 0)),
        scratch_shapes=[
            # [x_t | h_{t-1}] staging buffer; its h half is also the carry.
            pltpu.VMEM((Bp, K), cdt),
        ],
        compiler_params=pltpu.CompilerParams(
            dimension_semantics=("arbitrary",),   # time is sequential
        ),
    )(xs_p, h0_p, prep["w_c"], prep["b_c"])

    return hs_p[:T, :B, :H]


def basic_rnn_sequence(xs, h0, wx, bx, wh, bh, *, nonlinearity="tanh",
                       compute_dtype=jnp.float32, time_chunk=8, out_dtype=None):
    prep = prepare_rnn_params(wx, bx, wh, bh, compute_dtype=compute_dtype)
    return basic_rnn_sequence_prepared(xs, h0, prep, nonlinearity=nonlinearity,
                                       time_chunk=time_chunk, out_dtype=out_dtype)


def basic_rnn_cell_prepared(x, hx, prep, *, nonlinearity="tanh"):
    """Single BasicRNNCell step (the PyTorch module's forward) with prepared params."""
    hs = basic_rnn_sequence_prepared(x[None], hx, prep,
                                     nonlinearity=nonlinearity, time_chunk=1)
    return hs[0]


def basic_rnn_cell(x, hx, wx, bx, wh, bh, *, nonlinearity="tanh",
                   compute_dtype=jnp.float32):
    prep = prepare_rnn_params(wx, bx, wh, bh, compute_dtype=compute_dtype)
    return basic_rnn_cell_prepared(x, hx, prep, nonlinearity=nonlinearity)


def init_params(key, input_size, hidden_size):
    """Matches reset_parameters: U(-1/sqrt(H), 1/sqrt(H)) for all params."""
    std = 1.0 / math.sqrt(hidden_size)
    k1, k2, k3, k4 = jax.random.split(key, 4)
    wx = jax.random.uniform(k1, (hidden_size, input_size), jnp.float32, -std, std)
    bx = jax.random.uniform(k2, (hidden_size,), jnp.float32, -std, std)
    wh = jax.random.uniform(k3, (hidden_size, hidden_size), jnp.float32, -std, std)
    bh = jax.random.uniform(k4, (hidden_size,), jnp.float32, -std, std)
    return wx, bx, wh, bh


if __name__ == "__main__":
    key = jax.random.PRNGKey(0)
    k_param, k_x, k_h, k_seq = jax.random.split(key, 4)

    batch, input_size, hidden_size, seq_len = 8, 16, 32, 8
    wx, bx, wh, bh = init_params(k_param, input_size, hidden_size)

    x = jax.random.normal(k_x, (batch, input_size), jnp.float32)
    hx = jax.random.normal(k_h, (batch, hidden_size), jnp.float32)
    xs = jax.random.normal(k_seq, (seq_len, batch, input_size), jnp.float32)

    # Single cell step (module forward semantics), with and without hx.
    hy = basic_rnn_cell(x, hx, wx, bx, wh, bh)
    hy0 = basic_rnn_cell(x, None, wx, bx, wh, bh)

    # Fused sequence: whole time loop in ONE grid step (time_chunk = T).
    hs = basic_rnn_sequence(xs, hx, wx, bx, wh, bh, time_chunk=8)

    # Prepared-params (decode-style) + bf16 MXU inputs, f32 accumulate / tanh.
    # NOTE: the recurrent feed is bf16-quantized each step -> error compounds
    # with T; tolerance below is validated at T=8.
    prep_bf16 = prepare_rnn_params(wx, bx, wh, bh, compute_dtype=jnp.bfloat16)
    hs_bf16 = basic_rnn_sequence_prepared(xs, hx, prep_bf16, time_chunk=4)

    # relu variant, time_chunk that does NOT divide T (exercises time padding).
    hs_relu = basic_rnn_sequence(xs, hx, wx, bx, wh, bh,
                                 nonlinearity="relu", time_chunk=3)

    jax.block_until_ready((hy, hy0, hs, hs_bf16, hs_relu))

    # ---------------- pure-JAX references ----------------
    ref_cell = jnp.tanh(x @ wx.T + bx + hx @ wh.T + bh)
    ref_cell0 = jnp.tanh(x @ wx.T + bx + bh)

    def ref_seq(xs, h0, act):
        def step(h, xt):
            h = act(xt @ wx.T + bx + h @ wh.T + bh)
            return h, h
        _, out = jax.lax.scan(step, h0, xs)
        return out

    ref_tanh = ref_seq(xs, hx, jnp.tanh)
    ref_relu = ref_seq(xs, hx, lambda a: jnp.maximum(a, 0.0))

    assert jnp.allclose(hy, ref_cell, atol=1e-4), "cell mismatch (hx given)"
    assert jnp.allclose(hy0, ref_cell0, atol=1e-4), "cell mismatch (hx=None)"
    assert jnp.allclose(hs, ref_tanh, atol=1e-4), "sequence mismatch (f32 tanh)"
    assert jnp.allclose(hs_relu, ref_relu, atol=1e-4), "sequence mismatch (relu)"
    assert jnp.allclose(hs_bf16, ref_tanh, atol=5e-2), "sequence mismatch (bf16)"

    print("KERNEL_OK")
</pallas_src>

<mosaic_0001>
module attributes {stable_mosaic.version = 11 : i64} {
  func.func @_rnn_chunk_kernel(%arg0: i32, %arg1: memref<1x8x128xf32, #tpu.memory_space<vmem>>, %arg2: memref<8x128xf32, #tpu.memory_space<vmem>>, %arg3: memref<256x128xf32, #tpu.memory_space<vmem>>, %arg4: memref<1x128xf32, #tpu.memory_space<vmem>>, %arg5: memref<1x8x128xf32, #tpu.memory_space<vmem>>, %arg6: memref<8x256xf32, #tpu.memory_space<vmem>>) attributes {dimension_semantics = [#tpu.dimension_semantics<arbitrary>], iteration_bounds = array<i64: 1>, scalar_prefetch = 0 : i64, scratch_operands = 1 : i64, tpu.core_type = #tpu.core_type<tc>, window_params = [{transform_indices = @transform_0, window_bounds = array<i64: 1, 8, 128>}, {pipeline_mode = #tpu.pipeline_mode<synchronous>, transform_indices = @transform_1, window_bounds = array<i64: 8, 128>}, {pipeline_mode = #tpu.pipeline_mode<synchronous>, transform_indices = @transform_2, window_bounds = array<i64: 256, 128>}, {pipeline_mode = #tpu.pipeline_mode<synchronous>, transform_indices = @transform_3, window_bounds = array<i64: 1, 128>}, {transform_indices = @transform_4, window_bounds = array<i64: 1, 8, 128>}]} {
    %c0_i32 = arith.constant 0 : i32
    %0 = arith.cmpi eq, %arg0, %c0_i32 : i32
    %1 = arith.extui %0 : i1 to i32
    %c0_i32_0 = arith.constant 0 : i32
    %2 = arith.cmpi ne, %1, %c0_i32_0 : i32
    scf.if %2 {
      %c0_14 = arith.constant 0 : index
      %c0_15 = arith.constant 0 : index
      %20 = vector.load %arg2[%c0_14, %c0_15] : memref<8x128xf32, #tpu.memory_space<vmem>>, vector<8x128xf32>
      %c0_16 = arith.constant 0 : index
      %c128_17 = arith.constant 128 : index
      %21 = vector.load %arg6[%c0_16, %c128_17] : memref<8x256xf32, #tpu.memory_space<vmem>>, vector<8x128xf32>
      tpu.vector_store %arg6[%c0_16, %c128_17], %20 {strides = array<i32>} : memref<8x256xf32, #tpu.memory_space<vmem>>, vector<8x128xf32>,
    } else {
    }
    %c0 = arith.constant 0 : index
    %c0_1 = arith.constant 0 : index
    %3 = vector.load %arg4[%c0, %c0_1] : memref<1x128xf32, #tpu.memory_space<vmem>>, vector<1x128xf32>
    %4 = vector.shape_cast %3 : vector<1x128xf32> to vector<1x128xf32>
    %5 = vector.broadcast %4 : vector<1x128xf32> to vector<8x128xf32>
    %c0_i32_2 = arith.constant 0 : i32
    %6 = arith.index_cast %c0_i32_2 : i32 to index
    %c0_3 = arith.constant 0 : index
    %c0_4 = arith.constant 0 : index
    %7 = vector.load %arg1[%6, %c0_3, %c0_4] : memref<1x8x128xf32, #tpu.memory_space<vmem>>, vector<1x8x128xf32>
    %8 = vector.shape_cast %7 : vector<1x8x128xf32> to vector<8x128xf32>
    %c0_5 = arith.constant 0 : index
    %c0_6 = arith.constant 0 : index
    %9 = vector.load %arg6[%c0_5, %c0_6] : memref<8x256xf32, #tpu.memory_space<vmem>>, vector<8x128xf32>
    tpu.vector_store %arg6[%c0_5, %c0_6], %8 {strides = array<i32>} : memref<8x256xf32, #tpu.memory_space<vmem>>, vector<8x128xf32>,
    %c0_7 = arith.constant 0 : index
    %c0_8 = arith.constant 0 : index
    %10 = vector.load %arg6[%c0_7, %c0_8] : memref<8x256xf32, #tpu.memory_space<vmem>>, vector<8x256xf32>
    %c0_9 = arith.constant 0 : index
    %c0_10 = arith.constant 0 : index
    %11 = vector.load %arg3[%c0_9, %c0_10] : memref<256x128xf32, #tpu.memory_space<vmem>>, vector<256x128xf32>
    %cst = arith.constant dense<0.000000e+00> : vector<8x128xf32>
    %12 = tpu.matmul %10, %11, %cst {dimension_numbers = #tpu.dot_dimension_numbers<[1], [0], [0], [1], [0, 0, 1, 1], [], []>} : vector<8x256xf32>, vector<256x128xf32>, vector<8x128xf32> -> vector<8x128xf32>
    %13 = arith.addf %12, %5 : vector<8x128xf32>
    %14 = math.tanh %13 : vector<8x128xf32>
    %15 = arith.index_cast %c0_i32_2 : i32 to index
    %c0_11 = arith.constant 0 : index
    %c0_12 = arith.constant 0 : index
    %16 = vector.load %arg5[%15, %c0_11, %c0_12] : memref<1x8x128xf32, #tpu.memory_space<vmem>>, vector<1x8x128xf32>
    %17 = vector.shape_cast %16 : vector<1x8x128xf32> to vector<8x128xf32>
    %18 = vector.shape_cast %14 : vector<8x128xf32> to vector<1x8x128xf32>
    tpu.vector_store %arg5[%15, %c0_11, %c0_12], %18 {strides = array<i32>} : memref<1x8x128xf32, #tpu.memory_space<vmem>>, vector<1x8x128xf32>,
    %c0_13 = arith.constant 0 : index
    %c128 = arith.constant 128 : index
    %19 = vector.load %arg6[%c0_13, %c128] : memref<8x256xf32, #tpu.memory_space<vmem>>, vector<8x128xf32>
    tpu.vector_store %arg6[%c0_13, %c128], %14 {strides = array<i32>} : memref<8x256xf32, #tpu.memory_space<vmem>>, vector<8x128xf32>,
    %c1_i32 = arith.constant 1 : i32
    return
  }
  func.func @transform_0(%arg0: i32) -> (i32, i32, i32) {
    %c0_i32 = arith.constant 0 : i32
    %c0_i32_0 = arith.constant 0 : i32
    %c0_i32_1 = arith.constant 0 : i32
    return %arg0, %c0_i32, %c0_i32_0 : i32, i32, i32
  }
  func.func @transform_1(%arg0: i32) -> (i32, i32) {
    %c0_i32 = arith.constant 0 : i32
    %c0_i32_0 = arith.constant 0 : i32
    %c0_i32_1 = arith.constant 0 : i32
    return %c0_i32, %c0_i32_0 : i32, i32
  }
  func.func @transform_2(%arg0: i32) -> (i32, i32) {
    %c0_i32 = arith.constant 0 : i32
    %c0_i32_0 = arith.constant 0 : i32
    %c0_i32_1 = arith.constant 0 : i32
    return %c0_i32, %c0_i32_0 : i32, i32
  }
  func.func @transform_3(%arg0: i32) -> (i32, i32) {
    %c0_i32 = arith.constant 0 : i32
    %c0_i32_0 = arith.constant 0 : i32
    %c0_i32_1 = arith.constant 0 : i32
    return %c0_i32, %c0_i32_0 : i32, i32
  }
  func.func @transform_4(%arg0: i32) -> (i32, i32, i32) {
    %c0_i32 = arith.constant 0 : i32
    %c0_i32_0 = arith.constant 0 : i32
    %c0_i32_1 = arith.constant 0 : i32
    return %arg0, %c0_i32, %c0_i32_0 : i32, i32, i32
  }
}

</mosaic_0001>

<bundles_post_ra>
// kernel: tpu_custom_call.1
= control target key start
LH: loop header
LB: loop body
LE: loop exit
PB: predicated region body
PF: predicated region fallthrough
CT: control target
= control target key end

     0   :  { %9 = vsyncpa [#allocation4], 0  ;;  %s369_s0 = inlined_call_operand.hbm [shape: f32[1,8,128], index: 0, kind: input, shape index: {}]   ;;  %s370_s1 = inlined_call_operand.hbm [shape: f32[8,128], index: 1, kind: input, shape index: {}]   ;;  %s371_s2 = inlined_call_operand.hbm [shape: f32[256,128], index: 2, kind: input, shape index: {}]   ;;  %s372_s3 = inlined_call_operand.vmem [shape: f32[1,128], index: 3, kind: input, shape index: {}]   ;;  %s373_s4 = inlined_call_operand.hbm [shape: f32[1,8,128], index: 4, kind: output, shape index: {}]  }
   0x1   :  { %10 = vsyncpa [#allocation7], 0 }
   0x2   :  { %11 = vsyncpa [#allocation5], 0  ;;  %s323_s15 = smov [#allocation6]   ;;  %s324_s17 = smov [#allocation3]  }
   0x3   :  { %s28_s16 = sshll.u32 %s323_s15, 4  ;;  %s18_s18 = sshll.u32 %s324_s17, 4  ;;  %s29_s16 = int_to_ptr.vmem [resolvable:$true] %s28_s16  ;;  %s19_s18 = int_to_ptr.vmem [resolvable:$true] %s18_s18 }
   0x4   :  { %s245_s19 = scalar_lea.vmem %s29_s16, 128  ;;  %p250_p1 = scmp.lt.s32.totalorder %s29_s16, %s29_s16 }
   0x5   :  { %p246_p0 = scmp.ne.s32.totalorder %s29_s16, %s245_s19  ;;  %p251_p2 = scmp.lt.s32.totalorder %s245_s19, %s245_s19 }
   0x7   :  { %p252_p3 = por %p251_p2, %p250_p1 }
   0x9   :  { %p253_p4 = pnand %p252_p3, %p246_p0 }
   0xb   :  { %256 = shalt.err (!%p253_p4)
}
   0xc   :  { %31 = dma.hbm_to_vmem [thread:$0]  %s370_s1, 128, %s29_s16, [#allocation7]  }
   0xd   :  { %s265_s22 = scalar_lea.vmem %s19_s18, 128  ;;  %p270_p6 = scmp.lt.s32.totalorder %s19_s18, %s19_s18 }
   0xe   :  { %p266_p5 = scmp.ne.s32.totalorder %s19_s18, %s265_s22  ;;  %p271_p7 = scmp.lt.s32.totalorder %s265_s22, %s265_s22 }
  0x10   :  { %p272_p8 = por %p271_p7, %p270_p6 }
  0x12   :  { %p273_p9 = pnand %p272_p8, %p266_p5 }
  0x14   :  { %276 = shalt.err (!%p273_p9)
}
  0x15   :  { %21 = dma.hbm_to_vmem [thread:$0]  %s369_s0, 128, %s19_s18, [#allocation4]  }
  0x16   :  { %s325_s25 = smov [#allocation8]  }
  0x17   :  { %s37_s26 = sshll.u32 %s325_s25, 4  ;;  %s38_s26 = int_to_ptr.vmem [resolvable:$true] %s37_s26 }
  0x18   :  { %s285_s27 = scalar_lea.vmem %s38_s26, 4096  ;;  %p290_p11 = scmp.lt.s32.totalorder %s38_s26, %s38_s26 }
  0x19   :  { %p286_p10 = scmp.ne.s32.totalorder %s38_s26, %s285_s27  ;;  %p291_p12 = scmp.lt.s32.totalorder %s285_s27, %s285_s27 }
  0x1b   :  { %p292_p13 = por %p291_p12, %p290_p11 }
  0x1d   :  { %p293_p0 = pnand %p292_p13, %p286_p10 }
  0x1f   :  { %296 = shalt.err (!%p293_p0)
}
  0x20   :  { %s326_s1 = smov 128   ;;  %s327_s28 = smov 8  }
  0x21   :  { %43 = dma.hbm_to_vmem [thread:$0]  %s371_s2, 4096, %s38_s26, [#allocation7], %s326_s1, %s326_s1, %s327_s28  }
  0x22   :  { %317 = dma.done.wait [#allocation4], 128  }
  0x23   :  { %318 = vsyncadd [#allocation4], 4294967168 }
  0x24   :  { %319 = dma.done.wait [#allocation7], 4224  }
  0x25   :  { %320 = vsyncadd [#allocation7], 4294963072  ;;  %v103_v0 = vld [vmem:[#allocation8 + $0xf8] sm:$0xff]  ;;  %v102_v2 = vld [vmem:[#allocation8 + $0xf0] sm:$0xff]  ;;  %s328_s5 = smov [#allocation9]  }
  0x26   :  { %v87_v1 = vld [vmem:[#allocation8 + $0x78] sm:$0xff]  ;;  %194 = vmatprep.subr.mxu0 %v103_v0  ;;  %v86_v3 = vld [vmem:[#allocation8 + $0x70] sm:$0xff]  ;;  %v101_v4 = vld [vmem:[#allocation8 + $0xe8] sm:$0xff]  ;;  %s183_s6 = sshll.u32 %s328_s5, 4  ;;  %s184_s6 = int_to_ptr.vmem [resolvable:$true] %s183_s6 }
  0x27   :  { %195 = vmatpush3.msra.mxu0 %v87_v1  ;;  %v85_v5 = vld [vmem:[#allocation8 + $0x68] sm:$0xff]  ;;  %v100_v6 = vld [vmem:[#allocation8 + $0xe0] sm:$0xff]  ;;  %v99_v8 = vld [vmem:[#allocation8 + $0xd8] sm:$0xff]  ;;  %s297_s7 = scalar_lea.vmem %s184_s6, 128  ;;  %p302_p2 = scmp.lt.s32.totalorder %s184_s6, %s184_s6 }
  0x28   :  { %196 = vmatprep.subr.mxu0 %v102_v2  ;;  %v84_v7 = vld [vmem:[#allocation8 + $0x60] sm:$0xff]  ;;  %v83_v9 = vld [vmem:[#allocation8 + $0x58] sm:$0xff]  ;;  %v98_v10 = vld [vmem:[#allocation8 + $0xd0] sm:$0xff]  ;;  %p298_p1 = scmp.ne.s32.totalorder %s184_s6, %s297_s7  ;;  %p303_p3 = scmp.lt.s32.totalorder %s297_s7, %s297_s7 }
  0x29   :  { %197 = vmatpush3.msra.mxu0 %v86_v3  ;;  %v82_v11 = vld [vmem:[#allocation8 + $0x50] sm:$0xff]  ;;  %v97_v12 = vld [vmem:[#allocation8 + $0xc8] sm:$0xff]  ;;  %v59_v13 = vld [vmem:[#allocation6] sm:$0xff] }
  0x2a   :  { %198 = vmatprep.subr.mxu0 %v101_v4  ;;  %v81_v14 = vld [vmem:[#allocation8 + $0x48] sm:$0xff]  ;;  %168 = vmatprep.mubr.f32.mxu0 %v59_v13  ;;  %v96_v15 = vld [vmem:[#allocation8 + $0xc0] sm:$0xff]  ;;  %v95_v17 = vld [vmem:[#allocation8 + $0xb8] sm:$0xff]  ;;  %p304_p4 = por %p303_p3, %p302_p2 }
  0x2b   :  { %199 = vmatpush3.msra.mxu0 %v85_v5  ;;  %v80_v16 = vld [vmem:[#allocation8 + $0x40] sm:$0xff]  ;;  %v79_v18 = vld [vmem:[#allocation8 + $0x38] sm:$0xff]  ;;  %v94_v19 = vld [vmem:[#allocation8 + $0xb0] sm:$0xff] }
  0x2c   :  { %200 = vmatprep.subr.mxu0 %v100_v6  ;;  %v78_v20 = vld [vmem:[#allocation8 + $0x30] sm:$0xff]  ;;  %v93_v21 = vld [vmem:[#allocation8 + $0xa8] sm:$0xff]  ;;  %v92_v23 = vld [vmem:[#allocation8 + $0xa0] sm:$0xff]  ;;  %p305_p5 = pnand %p304_p4, %p298_p1 }
  0x2d   :  { %201 = vmatpush3.msra.mxu0 %v84_v7  ;;  %v77_v22 = vld [vmem:[#allocation8 + $0x28] sm:$0xff]  ;;  %v76_v24 = vld [vmem:[#allocation8 + $0x20] sm:$0xff]  ;;  %v91_v25 = vld [vmem:[#allocation8 + $0x98] sm:$0xff] }
  0x2e   :  { %202 = vmatprep.subr.mxu0 %v99_v8  ;;  %v75_v26 = vld [vmem:[#allocation8 + $0x18] sm:$0xff]  ;;  %v90_v27 = vld [vmem:[#allocation8 + $0x90] sm:$0xff]  ;;  %v89_v29 = vld [vmem:[#allocation8 + $0x88] sm:$0xff] }
  0x2f   :  { %203 = vmatpush3.msra.mxu0 %v83_v9  ;;  %v74_v28 = vld [vmem:[#allocation8 + $0x10] sm:$0xff]  ;;  %v73_v30 = vld [vmem:[#allocation8 + $0x8] sm:$0xff]  ;;  %v88_v31 = vld [vmem:[#allocation8 + $0x80] sm:$0xff] }
  0x30   :  { %204 = vmatprep.subr.mxu0 %v98_v10  ;;  %v72_v32 = vld [vmem:[#allocation8] sm:$0xff]  ;;  %v68_v33 = vld [vmem:[#allocation3] sm:$0xff] }
  0x31   :  { %205 = vmatpush3.msra.mxu0 %v82_v11  ;;  %v193_v35 = vld [vmem:[%s372_s3] ss:$0 sm:$0xff] }
  0x32   :  { %206 = vmatprep.subr.mxu0 %v97_v12 }
  0x33   :  { %207 = vmatpush3.msra.mxu0 %v81_v14 }
  0x34   :  { %208 = vmatprep.subr.mxu0 %v96_v15 }
  0x35   :  { %209 = vmatpush3.msra.mxu0 %v80_v16 }
  0x36   :  { %210 = vmatprep.subr.mxu0 %v95_v17 }
  0x37   :  { %211 = vmatpush3.msra.mxu0 %v79_v18 }
  0x38   :  { %212 = vmatprep.subr.mxu0 %v94_v19 }
  0x39   :  { %213 = vmatpush3.msra.mxu0 %v78_v20 }
  0x3a   :  { %214 = vmatprep.subr.mxu0 %v93_v21 }
  0x3b   :  { %215 = vmatpush3.msra.mxu0 %v77_v22 }
  0x3c   :  { %216 = vmatprep.subr.mxu0 %v92_v23 }
  0x3d   :  { %217 = vmatpush3.msra.mxu0 %v76_v24 }
  0x3e   :  { %218 = vmatprep.subr.mxu0 %v91_v25 }
  0x3f   :  { %219 = vmatpush3.msra.mxu0 %v75_v26 }
  0x40   :  { %220 = vmatprep.subr.mxu0 %v90_v27 }
  0x41   :  { %221 = vmatpush3.msra.mxu0 %v74_v28 }
  0x42   :  { %222 = vmatprep.subr.mxu0 %v89_v29 }
  0x43   :  { %223 = vmatpush3.msra.mxu0 %v73_v30 }
  0x44   :  { %224 = vmatprep.subr.mxu0 %v88_v31 }
  0x45   :  { %225 = vmatpush3.msra.mxu0 %v72_v32 }
  0x46   :  { %169 = vmatmul.mubr.f32.vlgmr.msra.gmra.mxu0 %v68_v33 }
 0x106   :  { %v226_v34 = vpop.f32.mrf.mxu0 }
 0x108   :  { %v227_v36 = vpop.f32.mrf.mxu0 }
 0x109   :  { %v228_v37 = vadd.f32 %v227_v36, %v226_v34 }
 0x10b   :  { %v171_v38 = vadd.f32 %v228_v37, %v193_v35 }
 0x10d   :  { %235 = vtanh.f32 %v171_v38 }
 0x11a   :  { %v236_v39 = vpop.eup %235 }
 0x11b   :  { %175 = vst [vmem:[#allocation9] sm:$0xff] %v236_v39 }
 0x11c   :  { %308 = shalt.err (!%p305_p5)
}
 0x11d   :  { %186 = dma.vmem_to_hbm [thread:$0]  %s184_s6, 128, %s373_s4, [#allocation5]  }
 0x11e   :  { %321 = dma.done.wait [#allocation5], 128  }
 0x11f   :  { %322 = vsyncadd [#allocation5], 4294967168 }
 0x120   :  { %190 = vsyncpa [#allocation4], 1 }
 0x121   :  { %191 = vsyncpa [#allocation7], 1 }
 0x122   :  { %192 = vsyncpa [#allocation5], 1 }

</bundles_post_ra>
